<compile_context>
chip_gen: v5e
topology: v5e:2x2
jax: 0.10.0
libtpu: 0.0.40
codegen_flags: <defaults>
</compile_context>

<pallas_src>
import functools

import jax
import jax.numpy as jnp
from jax import lax
from jax.experimental import pallas as pl
from jax.experimental.pallas import tpu as pltpu


# ---------------------------------------------------------------------------
# Fused kernel: ReLU + zero-pad + depthwise dilated conv + 1x1 conv + BatchNorm
# Layout inside the kernel: rows = N*H (images stacked), lanes = W*C.
# ---------------------------------------------------------------------------
def dilconv_fused_kernel(x_ref, dwb_ref, pwb_ref, fold_ref, y_ref,
                         xpad_ref, acc_ref, *,
                         N, KH, KW, dilation, C_in, H, W, pad,
                         H_pad, H_out, W_out, inv_count, eps):
    # x_ref   : (N*H, W*C_in)            unpadded lane-flattened NHWC input
    # dwb_ref : (KH*KW, W_out*C_in)      depthwise weights tiled across W_out
    # pwb_ref : (W_out*C_in, W_out*C_out) block-diagonal 1x1-conv matrix
    # fold_ref: (W_out*C_out, W_out*C_out) fold[j*C+c, J*C+o] = (c == o)
    # y_ref   : (N*H_out, W_out*C_out)   normalized output (lane dense)
    # xpad_ref: (N*H_pad, W_pad*C_in)    VMEM scratch: zero-padded ReLU(x)
    # acc_ref : (N*H_out, W_out*C_in)    VMEM scratch: depthwise result
    WiCi = W * C_in
    WoCi = W_out * C_in

    # ---- ReLU + zero padding into VMEM scratch (one pass; replaces the
    #      wrapper's jnp.pad HBM round-trip; ReLU(0)=0 so padding stays valid).
    xpad_ref[...] = jnp.zeros_like(xpad_ref)
    for n in range(N):
        r = n * H_pad + pad
        xpad_ref[r:r + H, pad * C_in:pad * C_in + WiCi] = jnp.maximum(
            x_ref[n * H:(n + 1) * H, :], 0.0)

    # ---- Depthwise dilated conv (stride 1): each tap is a shifted *ref*
    #      window of the padded scratch times a broadcast weight row (VPU
    #      FMAs; the loads sit in spare load slots). Per-image results are
    #      stacked on the row axis so the 1x1 conv is a single matmul.
    for n in range(N):
        acc = jnp.zeros((H_out, WoCi), jnp.float32)
        for kh in range(KH):
            for kw in range(KW):
                k = kh * KW + kw
                r0 = n * H_pad + kh * dilation
                l0 = kw * dilation * C_in
                acc = acc + (xpad_ref[r0:r0 + H_out, l0:l0 + WoCi]
                             * dwb_ref[k:k + 1, :])
        acc_ref[n * H_out:(n + 1) * H_out, :] = acc

    # ---- 1x1 conv as ONE block-diagonal matmul over the whole batch:
    #      (N*H_out, W_out*C_in) x (W_out*C_in, W_out*C_out) -> lane-dense tile.
    y = jnp.dot(acc_ref[...], pwb_ref[...], preferred_element_type=jnp.float32)

    # ---- BatchNorm fully in-kernel (whole batch is in this grid step):
    #      per-lane sums -> tiny MXU fold to per-channel totals broadcast back
    #      to all lanes -> rsqrt -> apply. No y_pre HBM round-trip.
    s = jnp.sum(y, axis=0, keepdims=True)          # (1, W_out*C_out)
    q = jnp.sum(y * y, axis=0, keepdims=True)
    ch_s = jnp.dot(s, fold_ref[...], preferred_element_type=jnp.float32)
    ch_q = jnp.dot(q, fold_ref[...], preferred_element_type=jnp.float32)
    mean = ch_s * inv_count
    # TODO(synk): E[x^2] - mean^2 can cancel when |mean| >> std; use a shifted
    # sum-of-squares / Welford fold for production activation statistics.
    var = jnp.maximum(ch_q * inv_count - mean * mean, 0.0)   # biased variance
    scale = lax.rsqrt(var + eps)                              # gamma=1, beta=0
    y_ref[...] = (y - mean) * scale


# ---------------------------------------------------------------------------
# Wrapper
# ---------------------------------------------------------------------------
def dilconv_forward(x_nchw, dw_w, pw_w, *, stride, padding, dilation, eps=1e-5):
    """x_nchw: (N, C_in, H, W); dw_w: (KH, KW, C_in); pw_w: (C_in, C_out)."""
    if stride != 1:
        raise NotImplementedError("Pallas DilConv fast path assumes stride == 1")

    N, C_in, H, W = x_nchw.shape
    KH, KW, _ = dw_w.shape
    C_out = pw_w.shape[1]

    H_pad, W_pad = H + 2 * padding, W + 2 * padding
    H_out = H_pad - dilation * (KH - 1)
    W_out = W_pad - dilation * (KW - 1)
    WiCi, WpCi = W * C_in, W_pad * C_in
    WoCi, WoCo = W_out * C_in, W_out * C_out

    f32 = jnp.float32
    # NCHW -> lane-flattened NHWC (rows = N*H, lanes = W*C_in). Single XLA
    # layout pass; zero padding now happens inside the kernel.
    x2d = jnp.transpose(x_nchw, (0, 2, 3, 1)).astype(f32).reshape(N * H, WiCi)

    # Depthwise weights tiled across W_out: dwb[kh*KW+kw, j*C_in+c] = dw[kh,kw,c]
    dwb = jnp.tile(dw_w.astype(f32).reshape(KH * KW, 1, C_in),
                   (1, W_out, 1)).reshape(KH * KW, WoCi)
    # Block-diagonal pointwise matrix: pwb[j*C_in+c, j*C_out+o] = pw[c, o]
    pwb = jnp.einsum("jJ,co->jcJo", jnp.eye(W_out, dtype=f32),
                     pw_w.astype(f32)).reshape(WoCi, WoCo)
    # Per-channel fold/broadcast matrix for BN: fold[j*C+c, J*C+o] = (c == o)
    fold = jnp.tile(jnp.eye(C_out, dtype=f32), (W_out, W_out))

    kernel = functools.partial(
        dilconv_fused_kernel,
        N=N, KH=KH, KW=KW, dilation=dilation, C_in=C_in, H=H, W=W,
        pad=padding, H_pad=H_pad, H_out=H_out, W_out=W_out,
        inv_count=1.0 / float(N * H_out * W_out), eps=float(eps))

    y2d = pl.pallas_call(
        kernel,
        grid=(1,),
        in_specs=[
            pl.BlockSpec((N * H, WiCi), lambda i: (0, 0)),
            pl.BlockSpec((KH * KW, WoCi), lambda i: (0, 0)),
            pl.BlockSpec((WoCi, WoCo), lambda i: (0, 0)),
            pl.BlockSpec((WoCo, WoCo), lambda i: (0, 0)),
        ],
        out_specs=pl.BlockSpec((N * H_out, WoCo), lambda i: (0, 0)),
        out_shape=jax.ShapeDtypeStruct((N * H_out, WoCo), f32),
        scratch_shapes=[
            pltpu.VMEM((N * H_pad, WpCi), f32),   # padded ReLU(x)
            pltpu.VMEM((N * H_out, WoCi), f32),   # stacked depthwise result
        ],
    )(x2d, dwb, pwb, fold)

    # Back to NCHW (XLA layout pass; see TODO at top about NHWC consumers).
    y = y2d.reshape(N, H_out, W_out, C_out)
    return jnp.transpose(y, (0, 3, 1, 2))


# ---------------------------------------------------------------------------
# Pure-JAX reference (for verification)
# ---------------------------------------------------------------------------
def dilconv_reference(x_nchw, dw_w, pw_w, *, stride, padding, dilation,
                      eps=1e-5):
    N, C_in, H, W = x_nchw.shape
    KH, KW, _ = dw_w.shape
    x = jnp.maximum(jnp.transpose(x_nchw, (0, 2, 3, 1)), 0.0)
    dw = lax.conv_general_dilated(
        x, dw_w.reshape(KH, KW, 1, C_in),
        window_strides=(stride, stride),
        padding=[(padding, padding), (padding, padding)],
        rhs_dilation=(dilation, dilation),
        dimension_numbers=("NHWC", "HWIO", "NHWC"),
        feature_group_count=C_in)
    y = jnp.einsum("nhwc,cd->nhwd", dw, pw_w)
    mean = jnp.mean(y, axis=(0, 1, 2), keepdims=True)
    var = jnp.mean(jnp.square(y - mean), axis=(0, 1, 2), keepdims=True)
    y = (y - mean) * lax.rsqrt(var + eps)
    return jnp.transpose(y, (0, 3, 1, 2))


if __name__ == "__main__":
    # Module config: DilConv(C_in=4, C_out=8, kernel_size=3, stride=1,
    #                        padding=2, dilation=2)  (seperate=True,
    #                        use_ABN=False, affine=True -> gamma=1, beta=0)
    C_in, C_out = 4, 8
    kernel_size, stride, padding, dilation = 3, 1, 2, 2
    N, H, W = 2, 16, 16

    key = jax.random.PRNGKey(0)
    kx, kdw, kpw = jax.random.split(key, 3)

    x = jax.random.normal(kx, (N, C_in, H, W), dtype=jnp.float32)

    # kaiming_normal_-style init (gain=sqrt(2), mode=fan_in), deterministic.
    fan_in_dw = 1 * kernel_size * kernel_size        # depthwise: C_in/groups = 1
    dw_w = jax.random.normal(kdw, (kernel_size, kernel_size, C_in),
                             dtype=jnp.float32) * (2.0 / fan_in_dw) ** 0.5
    fan_in_pw = C_in * 1 * 1
    pw_w = jax.random.normal(kpw, (C_in, C_out),
                             dtype=jnp.float32) * (2.0 / fan_in_pw) ** 0.5

    out = dilconv_forward(x, dw_w, pw_w, stride=stride, padding=padding,
                          dilation=dilation)
    out = jax.block_until_ready(out)

    ref = dilconv_reference(x, dw_w, pw_w, stride=stride, padding=padding,
                            dilation=dilation)
    assert out.shape == (N, C_out, H, W), out.shape
    max_err = float(jnp.max(jnp.abs(out - ref)))
    assert jnp.allclose(out, ref, atol=5e-4, rtol=5e-4), max_err

    print("KERNEL_OK")
</pallas_src>

<mosaic_0001>
module attributes {stable_mosaic.version = 11 : i64} {
  func.func @dilconv_fused_kernel(%arg0: i32, %arg1: memref<32x64xf32, #tpu.memory_space<vmem>>, %arg2: memref<9x64xf32, #tpu.memory_space<vmem>>, %arg3: memref<64x128xf32, #tpu.memory_space<vmem>>, %arg4: memref<128x128xf32, #tpu.memory_space<vmem>>, %arg5: memref<32x128xf32, #tpu.memory_space<vmem>>, %arg6: memref<40x80xf32, #tpu.memory_space<vmem>>, %arg7: memref<32x64xf32, #tpu.memory_space<vmem>>) attributes {dimension_semantics = [#tpu.dimension_semantics<arbitrary>], iteration_bounds = array<i64: 1>, scalar_prefetch = 0 : i64, scratch_operands = 2 : i64, tpu.core_type = #tpu.core_type<tc>, window_params = [{pipeline_mode = #tpu.pipeline_mode<synchronous>, transform_indices = @transform_0, window_bounds = array<i64: 32, 64>}, {pipeline_mode = #tpu.pipeline_mode<synchronous>, transform_indices = @transform_1, window_bounds = array<i64: 9, 64>}, {pipeline_mode = #tpu.pipeline_mode<synchronous>, transform_indices = @transform_2, window_bounds = array<i64: 64, 128>}, {pipeline_mode = #tpu.pipeline_mode<synchronous>, transform_indices = @transform_3, window_bounds = array<i64: 128, 128>}, {pipeline_mode = #tpu.pipeline_mode<synchronous>, transform_indices = @transform_4, window_bounds = array<i64: 32, 128>}]} {
    %cst = arith.constant 0.000000e+00 : f32
    %0 = vector.broadcast %cst : f32 to vector<40x80xf32>
    %c0 = arith.constant 0 : index
    %c0_0 = arith.constant 0 : index
    %1 = vector.load %arg6[%c0, %c0_0] : memref<40x80xf32, #tpu.memory_space<vmem>>, vector<40x80xf32>
    tpu.vector_store %arg6[%c0, %c0_0], %0 {strides = array<i32>} : memref<40x80xf32, #tpu.memory_space<vmem>>, vector<40x80xf32>,
    %c0_1 = arith.constant 0 : index
    %c0_2 = arith.constant 0 : index
    %2 = vector.load %arg1[%c0_1, %c0_2] : memref<32x64xf32, #tpu.memory_space<vmem>>, vector<16x64xf32>
    %cst_3 = arith.constant 0.000000e+00 : f32
    %3 = vector.broadcast %cst_3 : f32 to vector<16x64xf32>
    %4 = arith.maximumf %2, %3 : vector<16x64xf32>
    %c2 = arith.constant 2 : index
    %c8 = arith.constant 8 : index
    %5 = vector.load %arg6[%c2, %c8] : memref<40x80xf32, #tpu.memory_space<vmem>>, vector<16x64xf32>
    tpu.vector_store %arg6[%c2, %c8], %4 {strides = array<i32>} : memref<40x80xf32, #tpu.memory_space<vmem>>, vector<16x64xf32>,
    %c16 = arith.constant 16 : index
    %c0_4 = arith.constant 0 : index
    %6 = vector.load %arg1[%c16, %c0_4] : memref<32x64xf32, #tpu.memory_space<vmem>>, vector<16x64xf32>
    %cst_5 = arith.constant 0.000000e+00 : f32
    %7 = vector.broadcast %cst_5 : f32 to vector<16x64xf32>
    %8 = arith.maximumf %6, %7 : vector<16x64xf32>
    %c22 = arith.constant 22 : index
    %c8_6 = arith.constant 8 : index
    %9 = vector.load %arg6[%c22, %c8_6] : memref<40x80xf32, #tpu.memory_space<vmem>>, vector<16x64xf32>
    tpu.vector_store %arg6[%c22, %c8_6], %8 {strides = array<i32>} : memref<40x80xf32, #tpu.memory_space<vmem>>, vector<16x64xf32>,
    %cst_7 = arith.constant 0.000000e+00 : f32
    %10 = vector.broadcast %cst_7 : f32 to vector<16x64xf32>
    %c0_8 = arith.constant 0 : index
    %c0_9 = arith.constant 0 : index
    %11 = vector.load %arg6[%c0_8, %c0_9] : memref<40x80xf32, #tpu.memory_space<vmem>>, vector<16x64xf32>
    %c0_10 = arith.constant 0 : index
    %c0_11 = arith.constant 0 : index
    %12 = vector.load %arg2[%c0_10, %c0_11] : memref<9x64xf32, #tpu.memory_space<vmem>>, vector<1x64xf32>
    %13 = vector.broadcast %12 : vector<1x64xf32> to vector<16x64xf32>
    %14 = arith.mulf %11, %13 : vector<16x64xf32>
    %15 = arith.addf %10, %14 : vector<16x64xf32>
    %c0_12 = arith.constant 0 : index
    %c8_13 = arith.constant 8 : index
    %16 = vector.load %arg6[%c0_12, %c8_13] : memref<40x80xf32, #tpu.memory_space<vmem>>, vector<16x64xf32>
    %c1 = arith.constant 1 : index
    %c0_14 = arith.constant 0 : index
    %17 = vector.load %arg2[%c1, %c0_14] : memref<9x64xf32, #tpu.memory_space<vmem>>, vector<1x64xf32>
    %18 = vector.broadcast %17 : vector<1x64xf32> to vector<16x64xf32>
    %19 = arith.mulf %16, %18 : vector<16x64xf32>
    %20 = arith.addf %15, %19 : vector<16x64xf32>
    %c0_15 = arith.constant 0 : index
    %c16_16 = arith.constant 16 : index
    %21 = vector.load %arg6[%c0_15, %c16_16] : memref<40x80xf32, #tpu.memory_space<vmem>>, vector<16x64xf32>
    %c2_17 = arith.constant 2 : index
    %c0_18 = arith.constant 0 : index
    %22 = vector.load %arg2[%c2_17, %c0_18] : memref<9x64xf32, #tpu.memory_space<vmem>>, vector<1x64xf32>
    %23 = vector.broadcast %22 : vector<1x64xf32> to vector<16x64xf32>
    %24 = arith.mulf %21, %23 : vector<16x64xf32>
    %25 = arith.addf %20, %24 : vector<16x64xf32>
    %c2_19 = arith.constant 2 : index
    %c0_20 = arith.constant 0 : index
    %26 = vector.load %arg6[%c2_19, %c0_20] : memref<40x80xf32, #tpu.memory_space<vmem>>, vector<16x64xf32>
    %c3 = arith.constant 3 : index
    %c0_21 = arith.constant 0 : index
    %27 = vector.load %arg2[%c3, %c0_21] : memref<9x64xf32, #tpu.memory_space<vmem>>, vector<1x64xf32>
    %28 = vector.broadcast %27 : vector<1x64xf32> to vector<16x64xf32>
    %29 = arith.mulf %26, %28 : vector<16x64xf32>
    %30 = arith.addf %25, %29 : vector<16x64xf32>
    %c2_22 = arith.constant 2 : index
    %c8_23 = arith.constant 8 : index
    %31 = vector.load %arg6[%c2_22, %c8_23] : memref<40x80xf32, #tpu.memory_space<vmem>>, vector<16x64xf32>
    %c4 = arith.constant 4 : index
    %c0_24 = arith.constant 0 : index
    %32 = vector.load %arg2[%c4, %c0_24] : memref<9x64xf32, #tpu.memory_space<vmem>>, vector<1x64xf32>
    %33 = vector.broadcast %32 : vector<1x64xf32> to vector<16x64xf32>
    %34 = arith.mulf %31, %33 : vector<16x64xf32>
    %35 = arith.addf %30, %34 : vector<16x64xf32>
    %c2_25 = arith.constant 2 : index
    %c16_26 = arith.constant 16 : index
    %36 = vector.load %arg6[%c2_25, %c16_26] : memref<40x80xf32, #tpu.memory_space<vmem>>, vector<16x64xf32>
    %c5 = arith.constant 5 : index
    %c0_27 = arith.constant 0 : index
    %37 = vector.load %arg2[%c5, %c0_27] : memref<9x64xf32, #tpu.memory_space<vmem>>, vector<1x64xf32>
    %38 = vector.broadcast %37 : vector<1x64xf32> to vector<16x64xf32>
    %39 = arith.mulf %36, %38 : vector<16x64xf32>
    %40 = arith.addf %35, %39 : vector<16x64xf32>
    %c4_28 = arith.constant 4 : index
    %c0_29 = arith.constant 0 : index
    %41 = vector.load %arg6[%c4_28, %c0_29] : memref<40x80xf32, #tpu.memory_space<vmem>>, vector<16x64xf32>
    %c6 = arith.constant 6 : index
    %c0_30 = arith.constant 0 : index
    %42 = vector.load %arg2[%c6, %c0_30] : memref<9x64xf32, #tpu.memory_space<vmem>>, vector<1x64xf32>
    %43 = vector.broadcast %42 : vector<1x64xf32> to vector<16x64xf32>
    %44 = arith.mulf %41, %43 : vector<16x64xf32>
    %45 = arith.addf %40, %44 : vector<16x64xf32>
    %c4_31 = arith.constant 4 : index
    %c8_32 = arith.constant 8 : index
    %46 = vector.load %arg6[%c4_31, %c8_32] : memref<40x80xf32, #tpu.memory_space<vmem>>, vector<16x64xf32>
    %c7 = arith.constant 7 : index
    %c0_33 = arith.constant 0 : index
    %47 = vector.load %arg2[%c7, %c0_33] : memref<9x64xf32, #tpu.memory_space<vmem>>, vector<1x64xf32>
    %48 = vector.broadcast %47 : vector<1x64xf32> to vector<16x64xf32>
    %49 = arith.mulf %46, %48 : vector<16x64xf32>
    %50 = arith.addf %45, %49 : vector<16x64xf32>
    %c4_34 = arith.constant 4 : index
    %c16_35 = arith.constant 16 : index
    %51 = vector.load %arg6[%c4_34, %c16_35] : memref<40x80xf32, #tpu.memory_space<vmem>>, vector<16x64xf32>
    %c8_36 = arith.constant 8 : index
    %c0_37 = arith.constant 0 : index
    %52 = vector.load %arg2[%c8_36, %c0_37] : memref<9x64xf32, #tpu.memory_space<vmem>>, vector<1x64xf32>
    %53 = vector.broadcast %52 : vector<1x64xf32> to vector<16x64xf32>
    %54 = arith.mulf %51, %53 : vector<16x64xf32>
    %55 = arith.addf %50, %54 : vector<16x64xf32>
    %c0_38 = arith.constant 0 : index
    %c0_39 = arith.constant 0 : index
    %56 = vector.load %arg7[%c0_38, %c0_39] : memref<32x64xf32, #tpu.memory_space<vmem>>, vector<16x64xf32>
    tpu.vector_store %arg7[%c0_38, %c0_39], %55 {strides = array<i32>} : memref<32x64xf32, #tpu.memory_space<vmem>>, vector<16x64xf32>,
    %cst_40 = arith.constant 0.000000e+00 : f32
    %57 = vector.broadcast %cst_40 : f32 to vector<16x64xf32>
    %c20 = arith.constant 20 : index
    %c0_41 = arith.constant 0 : index
    %58 = vector.load %arg6[%c20, %c0_41] : memref<40x80xf32, #tpu.memory_space<vmem>>, vector<16x64xf32>
    %c0_42 = arith.constant 0 : index
    %c0_43 = arith.constant 0 : index
    %59 = vector.load %arg2[%c0_42, %c0_43] : memref<9x64xf32, #tpu.memory_space<vmem>>, vector<1x64xf32>
    %60 = vector.broadcast %59 : vector<1x64xf32> to vector<16x64xf32>
    %61 = arith.mulf %58, %60 : vector<16x64xf32>
    %62 = arith.addf %57, %61 : vector<16x64xf32>
    %c20_44 = arith.constant 20 : index
    %c8_45 = arith.constant 8 : index
    %63 = vector.load %arg6[%c20_44, %c8_45] : memref<40x80xf32, #tpu.memory_space<vmem>>, vector<16x64xf32>
    %c1_46 = arith.constant 1 : index
    %c0_47 = arith.constant 0 : index
    %64 = vector.load %arg2[%c1_46, %c0_47] : memref<9x64xf32, #tpu.memory_space<vmem>>, vector<1x64xf32>
    %65 = vector.broadcast %64 : vector<1x64xf32> to vector<16x64xf32>
    %66 = arith.mulf %63, %65 : vector<16x64xf32>
    %67 = arith.addf %62, %66 : vector<16x64xf32>
    %c20_48 = arith.constant 20 : index
    %c16_49 = arith.constant 16 : index
    %68 = vector.load %arg6[%c20_48, %c16_49] : memref<40x80xf32, #tpu.memory_space<vmem>>, vector<16x64xf32>
    %c2_50 = arith.constant 2 : index
    %c0_51 = arith.constant 0 : index
    %69 = vector.load %arg2[%c2_50, %c0_51] : memref<9x64xf32, #tpu.memory_space<vmem>>, vector<1x64xf32>
    %70 = vector.broadcast %69 : vector<1x64xf32> to vector<16x64xf32>
    %71 = arith.mulf %68, %70 : vector<16x64xf32>
    %72 = arith.addf %67, %71 : vector<16x64xf32>
    %c22_52 = arith.constant 22 : index
    %c0_53 = arith.constant 0 : index
    %73 = vector.load %arg6[%c22_52, %c0_53] : memref<40x80xf32, #tpu.memory_space<vmem>>, vector<16x64xf32>
    %c3_54 = arith.constant 3 : index
    %c0_55 = arith.constant 0 : index
    %74 = vector.load %arg2[%c3_54, %c0_55] : memref<9x64xf32, #tpu.memory_space<vmem>>, vector<1x64xf32>
    %75 = vector.broadcast %74 : vector<1x64xf32> to vector<16x64xf32>
    %76 = arith.mulf %73, %75 : vector<16x64xf32>
    %77 = arith.addf %72, %76 : vector<16x64xf32>
    %c22_56 = arith.constant 22 : index
    %c8_57 = arith.constant 8 : index
    %78 = vector.load %arg6[%c22_56, %c8_57] : memref<40x80xf32, #tpu.memory_space<vmem>>, vector<16x64xf32>
    %c4_58 = arith.constant 4 : index
    %c0_59 = arith.constant 0 : index
    %79 = vector.load %arg2[%c4_58, %c0_59] : memref<9x64xf32, #tpu.memory_space<vmem>>, vector<1x64xf32>
    %80 = vector.broadcast %79 : vector<1x64xf32> to vector<16x64xf32>
    %81 = arith.mulf %78, %80 : vector<16x64xf32>
    %82 = arith.addf %77, %81 : vector<16x64xf32>
    %c22_60 = arith.constant 22 : index
    %c16_61 = arith.constant 16 : index
    %83 = vector.load %arg6[%c22_60, %c16_61] : memref<40x80xf32, #tpu.memory_space<vmem>>, vector<16x64xf32>
    %c5_62 = arith.constant 5 : index
    %c0_63 = arith.constant 0 : index
    %84 = vector.load %arg2[%c5_62, %c0_63] : memref<9x64xf32, #tpu.memory_space<vmem>>, vector<1x64xf32>
    %85 = vector.broadcast %84 : vector<1x64xf32> to vector<16x64xf32>
    %86 = arith.mulf %83, %85 : vector<16x64xf32>
    %87 = arith.addf %82, %86 : vector<16x64xf32>
    %c24 = arith.constant 24 : index
    %c0_64 = arith.constant 0 : index
    %88 = vector.load %arg6[%c24, %c0_64] : memref<40x80xf32, #tpu.memory_space<vmem>>, vector<16x64xf32>
    %c6_65 = arith.constant 6 : index
    %c0_66 = arith.constant 0 : index
    %89 = vector.load %arg2[%c6_65, %c0_66] : memref<9x64xf32, #tpu.memory_space<vmem>>, vector<1x64xf32>
    %90 = vector.broadcast %89 : vector<1x64xf32> to vector<16x64xf32>
    %91 = arith.mulf %88, %90 : vector<16x64xf32>
    %92 = arith.addf %87, %91 : vector<16x64xf32>
    %c24_67 = arith.constant 24 : index
    %c8_68 = arith.constant 8 : index
    %93 = vector.load %arg6[%c24_67, %c8_68] : memref<40x80xf32, #tpu.memory_space<vmem>>, vector<16x64xf32>
    %c7_69 = arith.constant 7 : index
    %c0_70 = arith.constant 0 : index
    %94 = vector.load %arg2[%c7_69, %c0_70] : memref<9x64xf32, #tpu.memory_space<vmem>>, vector<1x64xf32>
    %95 = vector.broadcast %94 : vector<1x64xf32> to vector<16x64xf32>
    %96 = arith.mulf %93, %95 : vector<16x64xf32>
    %97 = arith.addf %92, %96 : vector<16x64xf32>
    %c24_71 = arith.constant 24 : index
    %c16_72 = arith.constant 16 : index
    %98 = vector.load %arg6[%c24_71, %c16_72] : memref<40x80xf32, #tpu.memory_space<vmem>>, vector<16x64xf32>
    %c8_73 = arith.constant 8 : index
    %c0_74 = arith.constant 0 : index
    %99 = vector.load %arg2[%c8_73, %c0_74] : memref<9x64xf32, #tpu.memory_space<vmem>>, vector<1x64xf32>
    %100 = vector.broadcast %99 : vector<1x64xf32> to vector<16x64xf32>
    %101 = arith.mulf %98, %100 : vector<16x64xf32>
    %102 = arith.addf %97, %101 : vector<16x64xf32>
    %c16_75 = arith.constant 16 : index
    %c0_76 = arith.constant 0 : index
    %103 = vector.load %arg7[%c16_75, %c0_76] : memref<32x64xf32, #tpu.memory_space<vmem>>, vector<16x64xf32>
    tpu.vector_store %arg7[%c16_75, %c0_76], %102 {strides = array<i32>} : memref<32x64xf32, #tpu.memory_space<vmem>>, vector<16x64xf32>,
    %c0_77 = arith.constant 0 : index
    %c0_78 = arith.constant 0 : index
    %104 = vector.load %arg7[%c0_77, %c0_78] : memref<32x64xf32, #tpu.memory_space<vmem>>, vector<32x64xf32>
    %c0_79 = arith.constant 0 : index
    %c0_80 = arith.constant 0 : index
    %105 = vector.load %arg3[%c0_79, %c0_80] : memref<64x128xf32, #tpu.memory_space<vmem>>, vector<64x128xf32>
    %cst_81 = arith.constant dense<0.000000e+00> : vector<32x128xf32>
    %106 = tpu.matmul %104, %105, %cst_81 {dimension_numbers = #tpu.dot_dimension_numbers<[1], [0], [0], [1], [0, 0, 1, 1], [], []>} : vector<32x64xf32>, vector<64x128xf32>, vector<32x128xf32> -> vector<32x128xf32>
    %cst_82 = arith.constant dense<0.000000e+00> : vector<128xf32>
    %107 = vector.multi_reduction <add>, %106, %cst_82 [0] : vector<32x128xf32> to vector<128xf32>
    %108 = vector.shape_cast %107 : vector<128xf32> to vector<1x128xf32>
    %109 = arith.mulf %106, %106 : vector<32x128xf32>
    %cst_83 = arith.constant dense<0.000000e+00> : vector<128xf32>
    %110 = vector.multi_reduction <add>, %109, %cst_83 [0] : vector<32x128xf32> to vector<128xf32>
    %111 = vector.shape_cast %110 : vector<128xf32> to vector<1x128xf32>
    %c0_84 = arith.constant 0 : index
    %c0_85 = arith.constant 0 : index
    %112 = vector.load %arg4[%c0_84, %c0_85] : memref<128x128xf32, #tpu.memory_space<vmem>>, vector<128x128xf32>
    %cst_86 = arith.constant dense<0.000000e+00> : vector<1x128xf32>
    %113 = tpu.matmul %108, %112, %cst_86 {dimension_numbers = #tpu.dot_dimension_numbers<[1], [0], [0], [1], [0, 0, 1, 1], [], []>} : vector<1x128xf32>, vector<128x128xf32>, vector<1x128xf32> -> vector<1x128xf32>
    %c0_87 = arith.constant 0 : index
    %c0_88 = arith.constant 0 : index
    %114 = vector.load %arg4[%c0_87, %c0_88] : memref<128x128xf32, #tpu.memory_space<vmem>>, vector<128x128xf32>
    %cst_89 = arith.constant dense<0.000000e+00> : vector<1x128xf32>
    %115 = tpu.matmul %111, %114, %cst_89 {dimension_numbers = #tpu.dot_dimension_numbers<[1], [0], [0], [1], [0, 0, 1, 1], [], []>} : vector<1x128xf32>, vector<128x128xf32>, vector<1x128xf32> -> vector<1x128xf32>
    %cst_90 = arith.constant 0.001953125 : f32
    %116 = vector.broadcast %cst_90 : f32 to vector<1x128xf32>
    %117 = arith.mulf %113, %116 : vector<1x128xf32>
    %cst_91 = arith.constant 0.001953125 : f32
    %118 = vector.broadcast %cst_91 : f32 to vector<1x128xf32>
    %119 = arith.mulf %115, %118 : vector<1x128xf32>
    %120 = arith.mulf %117, %117 : vector<1x128xf32>
    %121 = arith.subf %119, %120 : vector<1x128xf32>
    %cst_92 = arith.constant 0.000000e+00 : f32
    %122 = vector.broadcast %cst_92 : f32 to vector<1x128xf32>
    %123 = arith.maximumf %121, %122 : vector<1x128xf32>
    %cst_93 = arith.constant 9.99999974E-6 : f32
    %124 = vector.broadcast %cst_93 : f32 to vector<1x128xf32>
    %125 = arith.addf %123, %124 : vector<1x128xf32>
    %126 = math.rsqrt %125 : vector<1x128xf32>
    %127 = vector.broadcast %117 : vector<1x128xf32> to vector<32x128xf32>
    %128 = arith.subf %106, %127 : vector<32x128xf32>
    %129 = vector.broadcast %126 : vector<1x128xf32> to vector<32x128xf32>
    %130 = arith.mulf %128, %129 : vector<32x128xf32>
    %c0_94 = arith.constant 0 : index
    %c0_95 = arith.constant 0 : index
    %131 = vector.load %arg5[%c0_94, %c0_95] : memref<32x128xf32, #tpu.memory_space<vmem>>, vector<32x128xf32>
    tpu.vector_store %arg5[%c0_94, %c0_95], %130 {strides = array<i32>} : memref<32x128xf32, #tpu.memory_space<vmem>>, vector<32x128xf32>,
    return
  }
  func.func @transform_0(%arg0: i32) -> (i32, i32) {
    %c0_i32 = arith.constant 0 : i32
    %c0_i32_0 = arith.constant 0 : i32
    %c0_i32_1 = arith.constant 0 : i32
    return %c0_i32, %c0_i32_0 : i32, i32
  }
  func.func @transform_1(%arg0: i32) -> (i32, i32) {
    %c0_i32 = arith.constant 0 : i32
    %c0_i32_0 = arith.constant 0 : i32
    %c0_i32_1 = arith.constant 0 : i32
    return %c0_i32, %c0_i32_0 : i32, i32
  }
  func.func @transform_2(%arg0: i32) -> (i32, i32) {
    %c0_i32 = arith.constant 0 : i32
    %c0_i32_0 = arith.constant 0 : i32
    %c0_i32_1 = arith.constant 0 : i32
    return %c0_i32, %c0_i32_0 : i32, i32
  }
  func.func @transform_3(%arg0: i32) -> (i32, i32) {
    %c0_i32 = arith.constant 0 : i32
    %c0_i32_0 = arith.constant 0 : i32
    %c0_i32_1 = arith.constant 0 : i32
    return %c0_i32, %c0_i32_0 : i32, i32
  }
  func.func @transform_4(%arg0: i32) -> (i32, i32) {
    %c0_i32 = arith.constant 0 : i32
    %c0_i32_0 = arith.constant 0 : i32
    %c0_i32_1 = arith.constant 0 : i32
    return %c0_i32, %c0_i32_0 : i32, i32
  }
}

</mosaic_0001>

<bundles_post_ra>
// kernel: tpu_custom_call.1
= control target key start
LH: loop header
LB: loop body
LE: loop exit
PB: predicated region body
PF: predicated region fallthrough
CT: control target
= control target key end

     0   :  { %9 = vsyncpa [#allocation5], 0  ;;  %s906_s0 = inlined_call_operand.hbm [shape: f32[32,64], index: 0, kind: input, shape index: {}]   ;;  %s907_s1 = inlined_call_operand.hbm [shape: f32[9,64], index: 1, kind: input, shape index: {}]   ;;  %s908_s2 = inlined_call_operand.hbm [shape: f32[64,128], index: 2, kind: input, shape index: {}]   ;;  %s909_s3 = inlined_call_operand.hbm [shape: f32[128,128], index: 3, kind: input, shape index: {}]   ;;  %s910_s4 = inlined_call_operand.hbm [shape: f32[32,128], index: 4, kind: output, shape index: {}]  }
   0x1   :  { %10 = vsyncpa [#allocation8], 0 }
   0x2   :  { %11 = vsyncpa [#allocation11], 0 }
   0x3   :  { %12 = vsyncpa [#allocation6], 0  ;;  %s30_s17 = sshll.u32 %s907_s1, 4  ;;  %s738_s18 = smov [#allocation7]   ;;  %s31_s17 = int_to_ptr.hbm [resolvable:$true] %s30_s17 }
   0x4   :  { %s32_s19 = sshll.u32 %s738_s18, 4  ;;  %s17_s22 = sshll.u32 %s906_s0, 4  ;;  %s33_s19 = int_to_ptr.vmem [resolvable:$true] %s32_s19  ;;  %s18_s22 = int_to_ptr.hbm [resolvable:$true] %s17_s22 }
   0x5   :  { %s739_s23 = smov 128   ;;  %s740_s24 = smov 8  }
   0x6   :  { %38 = dma.hbm_to_vmem [thread:$0]  %s31_s17, 256, %s33_s19, [#allocation8], %s739_s23, %s739_s23, %s740_s24  }
   0x7   :  { %s741_s25 = smov [#allocation4]   ;;  %s43_s1 = sshll.u32 %s908_s2, 4  ;;  %s44_s1 = int_to_ptr.hbm [resolvable:$true] %s43_s1 }
   0x8   :  { %s19_s26 = sshll.u32 %s741_s25, 4  ;;  %s56_s30 = sshll.u32 %s909_s3, 4  ;;  %s20_s26 = int_to_ptr.vmem [resolvable:$true] %s19_s26  ;;  %s57_s30 = int_to_ptr.hbm [resolvable:$true] %s56_s30 }
   0x9   :  { %25 = dma.hbm_to_vmem [thread:$0]  %s18_s22, 512, %s20_s26, [#allocation5], %s739_s23, %s739_s23, %s740_s24  }
   0xa   :  { %s742_s5 = smov [#allocation9]   ;;  %s743_s7 = smov [#allocation10]  }
   0xb   :  { %s45_s6 = sshll.u32 %s742_s5, 4  ;;  %s58_s2 = sshll.u32 %s743_s7, 4  ;;  %s46_s6 = int_to_ptr.vmem [resolvable:$true] %s45_s6  ;;  %s59_s2 = int_to_ptr.vmem [resolvable:$true] %s58_s2 }
   0xc   :  { %51 = dma.hbm_to_vmem [thread:$0]  %s44_s1, 1024, %s46_s6, [#allocation8], %s739_s23, %s739_s23, %s740_s24  }
   0xd   :  { %64 = dma.hbm_to_vmem [thread:$0]  %s57_s30, 2048, %s59_s2, [#allocation11], %s739_s23, %s739_s23, %s740_s24  }
   0xe   :  { %730 = dma.done.wait [#allocation5], 512  }
   0xf   :  { %731 = vsyncadd [#allocation5], 4294966784 }
  0x10   :  { %732 = dma.done.wait [#allocation8], 1280  }
  0x11   :  { %733 = vsyncadd [#allocation8], 4294966016 }
  0x12   :  { %734 = dma.done.wait [#allocation11], 2048  }
  0x13   :  { %735 = vsyncadd [#allocation11], 4294965248  ;;  %v102_v0 = vld [vmem:[#allocation4 + $0x10] sm:$0xff]  ;;  %v87_v1 = vld [vmem:[#allocation4] sm:$0xff]  ;;  %s744_s3 = smov 16   ;;  %vm81_vm0 = vcmask 654336  }
  0x14   :  { %v104_v2 = vmax.f32 %v102_v0, 0.0  ;;  %v89_v3 = vmax.f32 %v87_v1, 0.0  ;;  %v591_v4 = vld [vmem:[#allocation7 + $0x2] ss:$0 sm:$0xff]  ;;  %v88_v5 = vld [vmem:[#allocation4 + $0x8] sm:$0xff]  ;;  %v103_v9 = vld [vmem:[#allocation4 + $0x18] sm:$0xff] }
  0x15   :  { %145 = vrot.lane.b32.xlu2 %v591_v4, %s744_s3  ;;  %v590_v6 = vld [vmem:[#allocation7 + $0x1] ss:$0 sm:$0xff]  ;;  %v90_v7 = vmax.f32 %v88_v5, 0.0  ;;  %v593_v8 = vld [vmem:[#allocation7 + $0x4] ss:$0 sm:$0xff]  ;;  %v105_v11 = vmax.f32 %v103_v9, 0.0 }
  0x16   :  { %108 = vrot.lane.b32.xlu1 %v104_v2, %s740_s24  ;;  %93 = vrot.lane.b32.xlu0 %v89_v3, %s740_s24  ;;  %v592_v10 = vld [vmem:[#allocation7 + $0x5] ss:$0 sm:$0xff]  ;;  %v596_v12 = vld [vmem:[#allocation7 + $0x1] ss:$0 sm:$0xff]  ;;  %v594_v13 = vld [vmem:[#allocation7 + $0x7] ss:$0 sm:$0xff] }
  0x17   :  { %v595_v14 = vld [vmem:[#allocation7 + $0x2] ss:$0 sm:$0xff]  ;;  %v599_v15 = vld [vmem:[#allocation7 + $0x8] ss:$0 sm:$0xff]  ;;  %v597_v16 = vld [vmem:[#allocation7 + $0x5] ss:$0 sm:$0xff] }
  0x18   :  { %v598_v17 = vld [vmem:[#allocation7 + $0x4] ss:$0 sm:$0xff]  ;;  %v601_v18 = vld [vmem:[#allocation7 + $0x7] ss:$0 sm:$0xff]  ;;  %v600_v19 = vld [vmem:[#allocation7 + $0x8] ss:$0 sm:$0xff] }
  0x19   :  { %v745_v20 = vmov 0.0   ;;  %vm99_vm1 = vcmask 588864   ;;  %s746_s8 = smov 120   ;;  %s747_s9 = smov 112   ;;  %v396_v9 = vld [vmem:[#allocation9 + $0x38] sm:$0xff]  ;;  %vm248_vm2 = vcmask 523264  }
  0x1a   :  { %84 = vst.msk [vmem:[#allocation2 + $0x10] sm:$0xff] %vm81_vm0, %v745_v20  ;;  %571 = vmatpush.msra.mxu3 %v396_v9  ;;  %417 = vmatpush.msra.mxu0 %v396_v9  ;;  %s748_s10 = smov [#allocation12]   ;;  %s552_s14 = sshll.u32 %s910_s4, 4  ;;  %s553_s14 = int_to_ptr.hbm [resolvable:$true] %s552_s14 }
  0x1b   :  { %85 = vst.msk [vmem:[#allocation2 + $0x18] sm:$0xff] %vm81_vm0, %v745_v20  ;;  %s550_s11 = sshll.u32 %s748_s10, 4  ;;  %s551_s11 = int_to_ptr.vmem [resolvable:$true] %s550_s11 }
  0x1c   :  { %82 = vst.msk [vmem:[#allocation2] sm:$0xff] %vm81_vm0, %v745_v20 }
  0x1d   :  { %171 = vrot.lane.b32.xlu2 %v593_v8, %s740_s24  ;;  %83 = vst.msk [vmem:[#allocation2 + $0x8] sm:$0xff] %vm81_vm0, %v745_v20 }
  0x1e   :  { %127 = vrot.lane.b32.xlu1 %v590_v6, %s740_s24  ;;  %95 = vrot.lane.b32.xlu0 %v90_v7, %s740_s24  ;;  %86 = vst.msk [vmem:[#allocation2 + $0x20] sm:$0xff] %vm81_vm0, %v745_v20 }
  0x25   :  { %262 = vrot.lane.b32.xlu2 %v596_v12, %s740_s24  ;;  %v394_v12 = vld [vmem:[#allocation9 + $0x28] sm:$0xff] }
  0x26   :  { %189 = vrot.lane.b32.xlu1 %v592_v10, %s744_s3  ;;  %110 = vrot.lane.b32.xlu0 %v105_v11, %s740_s24  ;;  %v395_v10 = vld [vmem:[#allocation9 + $0x30] sm:$0xff] }
  0x27   :  { %572 = vmatpush.msra.mxu3 %v395_v10  ;;  %418 = vmatpush.msra.mxu0 %v395_v10 }
  0x29   :  { %573 = vmatpush.msra.mxu3 %v394_v12  ;;  %419 = vmatpush.msra.mxu0 %v394_v12 }
  0x2d   :  { %233 = vrot.lane.b32.xlu2 %v599_v15, %s744_s3  ;;  %v391_v15 = vld [vmem:[#allocation9 + $0x10] sm:$0xff] }
  0x2e   :  { %215 = vrot.lane.b32.xlu1 %v594_v13, %s740_s24  ;;  %280 = vrot.lane.b32.xlu0 %v595_v14, %s744_s3  ;;  %v393_v13 = vld [vmem:[#allocation9 + $0x20] sm:$0xff]  ;;  %v392_v14 = vld [vmem:[#allocation9 + $0x18] sm:$0xff] }
  0x2f   :  { %574 = vmatpush.msra.mxu3 %v393_v13  ;;  %420 = vmatpush.msra.mxu0 %v393_v13 }
  0x31   :  { %575 = vmatpush.msra.mxu3 %v392_v14  ;;  %421 = vmatpush.msra.mxu0 %v392_v14 }
  0x33   :  { %576 = vmatpush.msra.mxu3 %v391_v15  ;;  %422 = vmatpush.msra.mxu0 %v391_v15 }
  0x35   :  { %350 = vrot.lane.b32.xlu2 %v601_v18, %s740_s24  ;;  %v389_v18 = vld [vmem:[#allocation9] sm:$0xff] }
  0x36   :  { %324 = vrot.lane.b32.xlu1 %v597_v16, %s744_s3  ;;  %306 = vrot.lane.b32.xlu0 %v598_v17, %s740_s24  ;;  %v390_v17 = vld [vmem:[#allocation9 + $0x8] sm:$0xff] }
  0x37   :  { %577 = vmatpush.msra.mxu3 %v390_v17  ;;  %423 = vmatpush.msra.mxu0 %v390_v17 }
  0x39   :  { %578 = vmatpush.msra.mxu3 %v389_v18  ;;  %424 = vmatpush.msra.mxu0 %v389_v18 }
  0x3e   :  { %368 = vrot.lane.b32.xlu0 %v600_v19, %s744_s3  ;;  %v604_v19 = vld [vmem:[#allocation7] ss:$0 sm:$0xff] }
  0x6f   :  { %v146_v23 = vpop.permute.xlu2 %145 }
  0x77   :  { %v172_v26 = vpop.permute.xlu2 %171 }
  0x7f   :  { %v263_v34 = vpop.permute.xlu2 %262 }
  0x87   :  { %v234_v41 = vpop.permute.xlu2 %233 }
  0x88   :  { %v109_v21 = vpop.permute.xlu1 %108  ;;  %v94_v22 = vpop.permute.xlu0 %93 }
  0x89   :  { %114 = vst.msk [vmem:[#allocation2 + $0x16] sm:$0xff] %vm99_vm1, %v109_v21 }
  0x8a   :  { %100 = vst.msk [vmem:[#allocation2 + $0x2] sm:$0xff] %vm99_vm1, %v94_v22  ;;  %v603_v22 = vld [vmem:[#allocation7] ss:$0 sm:$0xff] }
  0x8f   :  { %v351_v54 = vpop.permute.xlu2 %350 }
  0x90   :  { %v96_v24 = vpop.permute.xlu0 %95  ;;  %v128_v25 = vpop.permute.xlu1 %127  ;;  %v818_v35 = vld [vmem:[#allocation2 + $0x14] sm:$0xff] }
  0x91   :  { %101 = vst.msk [vmem:[#allocation2 + $0xa] sm:$0xff] %vm99_vm1, %v96_v24  ;;  %v265_v37 = vmul.f32 %v263_v34, %v818_v35  ;;  %v828_v43 = vld [vmem:[#allocation2 + $0x16] sm:$0xff]  ;;  %v836_v48 = vld [vmem:[#allocation2] sm:$0xff]  ;;  %v602_v24 = vld [vmem:[#allocation7 + $0x3] ss:$0 sm:$0xff] }
  0x92   :  { %v130_v51 = vmul.f32 %v128_v25, %v836_v48  ;;  %v148_v57 = vmul.f32 %v146_v23, %v836_v48  ;;  %v854_v59 = vld [vmem:[#allocation2 + $0x2] sm:$0xff] }
  0x93   :  { %v174_v63 = vmul.f32 %v172_v26, %v854_v59 }
  0x98   :  { %v808_v27 = vld [vmem:[#allocation2 + $0xa] sm:$0xff]  ;;  %v111_v28 = vpop.permute.xlu0 %110  ;;  %v190_v33 = vpop.permute.xlu1 %189 }
  0x99   :  { %115 = vst.msk [vmem:[#allocation2 + $0x1e] sm:$0xff] %vm99_vm1, %v111_v28  ;;  %v810_v29 = vld [vmem:[#allocation2 + $0x8] sm:$0xff]  ;;  %v175_v30 = vmul.f32 %v172_v26, %v808_v27  ;;  %v193_v39 = vmul.f32 %v190_v33, %v808_v27  ;;  %v192_v2 = vmul.f32 %v190_v33, %v854_v59  ;;  %v165_v28 = vmul.f32 %v602_v24, %v808_v27 }
  0x9a   :  { %v149_v31 = vmul.f32 %v146_v23, %v810_v29  ;;  %v131_v32 = vmul.f32 %v128_v25, %v810_v29  ;;  %v826_v42 = vld [vmem:[#allocation2 + $0xc] sm:$0xff]  ;;  %v872_v5 = vld [vmem:[#allocation2 + $0x4] sm:$0xff]  ;;  %v121_v21 = vmul.f32 %v604_v19, %v810_v29 }
  0x9b   :  { %180 = vrot.lane.b32.xlu0 %v175_v30, %s746_s8  ;;  %v237_v46 = vmul.f32 %v234_v41, %v826_v42  ;;  %v236_v6 = vmul.f32 %v234_v41, %v872_v5  ;;  %v607_v27 = vld [vmem:[#allocation7 + $0x6] ss:$0 sm:$0xff] }
  0x9c   :  { %154 = vrot.lane.b32.xlu2 %v149_v31, %s747_s9  ;;  %136 = vrot.lane.b32.xlu1 %v131_v32, %s746_s8  ;;  %v255_v31 = vmul.f32 %v603_v22, %v818_v35  ;;  %v605_v32 = vld [vmem:[#allocation7 + $0x3] ss:$0 sm:$0xff] }
  0x9d   :  { %v299_v29 = vmul.f32 %v605_v32, %v828_v43 }
  0xa0   :  { %v281_v36 = vpop.permute.xlu0 %280  ;;  %v216_v40 = vpop.permute.xlu1 %215  ;;  %v838_v50 = vld [vmem:[#allocation2 + $0x1c] sm:$0xff] }
  0xa1   :  { %v283_v38 = vmul.f32 %v281_v36, %v818_v35  ;;  %v219_v47 = vmul.f32 %v216_v40, %v826_v42  ;;  %v266_v53 = vmul.f32 %v263_v34, %v838_v50  ;;  %v846_v55 = vld [vmem:[#allocation2 + $0x18] sm:$0xff]  ;;  %v284_v58 = vmul.f32 %v281_v36, %v838_v50  ;;  %v864_v1 = vld [vmem:[#allocation2 + $0x20] sm:$0xff]  ;;  %v606_v34 = vld [vmem:[#allocation7 + $0x6] ss:$0 sm:$0xff] }
  0xa2   :  { %v353_v56 = vmul.f32 %v351_v54, %v846_v55  ;;  %v856_v61 = vld [vmem:[#allocation2 + $0x1e] sm:$0xff]  ;;  %v354_v3 = vmul.f32 %v351_v54, %v864_v1  ;;  %v218_v8 = vmul.f32 %v216_v40, %v872_v5  ;;  %v343_v54 = vmul.f32 %v607_v27, %v846_v55 }
  0xa3   :  { %287 = vrot.lane.b32.xlu0 %v283_v38, %s747_s9 }
  0xa4   :  { %269 = vrot.lane.b32.xlu2 %v265_v37, %s746_s8  ;;  %198 = vrot.lane.b32.xlu1 %v193_v39, %s747_s9 }
  0xa8   :  { %v307_v44 = vpop.permute.xlu0 %306  ;;  %v325_v49 = vpop.permute.xlu1 %324 }
  0xa9   :  { %v309_v45 = vmul.f32 %v307_v44, %v828_v43  ;;  %v327_v52 = vmul.f32 %v325_v49, %v828_v43  ;;  %v310_v0 = vmul.f32 %v307_v44, %v856_v61  ;;  %v328_v4 = vmul.f32 %v325_v49, %v856_v61 }
  0xaa   :  { %v209_v44 = vmul.f32 %v606_v34, %v826_v42  ;;  %v120_v43 = vmul.f32 %v604_v19, %v836_v48  ;;  %v300_v48 = vmul.f32 %v605_v32, %v856_v61  ;;  %v344_v61 = vmul.f32 %v607_v27, %v864_v1  ;;  %v462_v27 = vld [vmem:[#allocation10 + $0x10] sm:$0xff] }
  0xab   :  { %313 = vrot.lane.b32.xlu0 %v309_v45, %s746_s8 }
  0xac   :  { %242 = vrot.lane.b32.xlu2 %v237_v46, %s747_s9  ;;  %224 = vrot.lane.b32.xlu1 %v219_v47, %s746_s8 }
  0xb0   :  { %v369_v60 = vpop.permute.xlu0 %368 }
  0xb1   :  { %v371_v62 = vmul.f32 %v369_v60, %v846_v55  ;;  %v372_v7 = vmul.f32 %v369_v60, %v864_v1  ;;  %v474_v1 = vld [vmem:[#allocation10 + $0x70] sm:$0xff] }
  0xb3   :  { %134 = vrot.lane.b32.xlu0 %v130_v51, %s746_s8 }
  0xb4   :  { %331 = vrot.lane.b32.xlu2 %v327_v52, %s747_s9  ;;  %271 = vrot.lane.b32.xlu1 %v266_v53, %s746_s8 }
  0xbb   :  { %357 = vrot.lane.b32.xlu0 %v353_v56, %s746_s8 }
  0xbc   :  { %152 = vrot.lane.b32.xlu2 %v148_v57, %s747_s9  ;;  %289 = vrot.lane.b32.xlu1 %v284_v58, %s747_s9 }
  0xc3   :  { %178 = vrot.lane.b32.xlu0 %v174_v63, %s746_s8 }
  0xc4   :  { %375 = vrot.lane.b32.xlu2 %v371_v62, %s747_s9  ;;  %315 = vrot.lane.b32.xlu1 %v310_v0, %s746_s8  ;;  %v164_v0 = vmul.f32 %v602_v24, %v854_v59 }
  0xcb   :  { %359 = vrot.lane.b32.xlu0 %v354_v3, %s746_s8 }
  0xcc   :  { %196 = vrot.lane.b32.xlu2 %v192_v2, %s747_s9  ;;  %333 = vrot.lane.b32.xlu1 %v328_v4, %s747_s9  ;;  %v256_v4 = vmul.f32 %v603_v22, %v838_v50  ;;  %v208_v50 = vmul.f32 %v606_v34, %v872_v5  ;;  %v475_v34 = vld [vmem:[#allocation10 + $0x78] sm:$0xff] }
  0xcd   :  { %476 = vmatpush.msra.mxu1 %v475_v34  ;;  %496 = vmatpush.msra.mxu2 %v475_v34 }
  0xcf   :  { %477 = vmatpush.msra.mxu1 %v474_v1  ;;  %497 = vmatpush.msra.mxu2 %v474_v1 }
  0xd3   :  { %240 = vrot.lane.b32.xlu0 %v236_v6, %s747_s9 }
  0xd4   :  { %377 = vrot.lane.b32.xlu2 %v372_v7, %s747_s9  ;;  %222 = vrot.lane.b32.xlu1 %v218_v8, %s746_s8 }
  0xf6   :  { %v155_v11 = vpop.permute.xlu2 %154 }
  0xfe   :  { %v270_v16 = vpop.permute.xlu2 %269 }
  0xff   :  { %v275_v36 = vadd.f32 %v270_v16, %v255_v31 }
 0x106   :  { %v243_v25 = vpop.permute.xlu2 %242 }
 0x10d   :  { %v181_v20 = vpop.permute.xlu0 %180 }
 0x10e   :  { %v137_v23 = vpop.permute.xlu1 %136  ;;  %v332_v46 = vpop.permute.xlu2 %331 }
 0x10f   :  { %v141_v26 = vadd.f32 %v137_v23, %v121_v21 }
 0x111   :  { %v159_v30 = vadd.f32 %v155_v11, %v141_v26 }
 0x113   :  { %v167_v33 = vadd.f32 %v165_v28, %v159_v30 }
 0x115   :  { %v288_v37 = vpop.permute.xlu0 %287  ;;  %v185_v38 = vadd.f32 %v181_v20, %v167_v33 }
 0x116   :  { %v293_v39 = vadd.f32 %v288_v37, %v275_v36  ;;  %v199_v40 = vpop.permute.xlu1 %198  ;;  %v153_v58 = vpop.permute.xlu2 %152  ;;  %v473_v36 = vld [vmem:[#allocation10 + $0x68] sm:$0xff]  ;;  %v472_v37 = vld [vmem:[#allocation10 + $0x60] sm:$0xff] }
 0x117   :  { %v203_v41 = vadd.f32 %v199_v40, %v185_v38  ;;  %478 = vmatpush.msra.mxu1 %v473_v36  ;;  %498 = vmatpush.msra.mxu2 %v473_v36  ;;  %v471_v38 = vld [vmem:[#allocation10 + $0x58] sm:$0xff]  ;;  %v469_v40 = vld [vmem:[#allocation10 + $0x48] sm:$0xff] }
 0x118   :  { %v301_v45 = vadd.f32 %v299_v29, %v293_v39  ;;  %v470_v39 = vld [vmem:[#allocation10 + $0x50] sm:$0xff]  ;;  %v468_v29 = vld [vmem:[#allocation10 + $0x40] sm:$0xff] }
 0x119   :  { %v211_v47 = vadd.f32 %v209_v44, %v203_v41  ;;  %479 = vmatpush.msra.mxu1 %v472_v37  ;;  %499 = vmatpush.msra.mxu2 %v472_v37  ;;  %v467_v41 = vld [vmem:[#allocation10 + $0x38] sm:$0xff]  ;;  %v466_v44 = vld [vmem:[#allocation10 + $0x30] sm:$0xff] }
 0x11b   :  { %480 = vmatpush.msra.mxu1 %v471_v38  ;;  %500 = vmatpush.msra.mxu2 %v471_v38 }
 0x11d   :  { %v314_v49 = vpop.permute.xlu0 %313  ;;  %481 = vmatpush.msra.mxu1 %v470_v39  ;;  %501 = vmatpush.msra.mxu2 %v470_v39 }
 0x11e   :  { %v319_v51 = vadd.f32 %v314_v49, %v301_v45  ;;  %v225_v35 = vpop.permute.xlu1 %224  ;;  %v376_v55 = vpop.permute.xlu2 %375  ;;  %v465_v45 = vld [vmem:[#allocation10 + $0x28] sm:$0xff] }
 0x11f   :  { %v229_v52 = vadd.f32 %v225_v35, %v211_v47  ;;  %482 = vmatpush.msra.mxu1 %v469_v40  ;;  %502 = vmatpush.msra.mxu2 %v469_v40  ;;  %v463_v47 = vld [vmem:[#allocation10 + $0x18] sm:$0xff]  ;;  %v461_v49 = vld [vmem:[#allocation10 + $0x8] sm:$0xff] }
 0x120   :  { %v337_v53 = vadd.f32 %v332_v46, %v319_v51  ;;  %v464_v46 = vld [vmem:[#allocation10 + $0x20] sm:$0xff] }
 0x121   :  { %v247_v56 = vadd.f32 %v243_v25, %v229_v52  ;;  %483 = vmatpush.msra.mxu1 %v468_v29  ;;  %503 = vmatpush.msra.mxu2 %v468_v29  ;;  %v460_v51 = vld [vmem:[#allocation10] sm:$0xff] }
 0x122   :  { %v345_v57 = vadd.f32 %v343_v54, %v337_v53 }
 0x123   :  { %250 = vst.msk [vmem:[#allocation3 + $0x8] sm:$0xff] %vm248_vm2, %v247_v56  ;;  %484 = vmatpush.msra.mxu1 %v467_v41  ;;  %504 = vmatpush.msra.mxu2 %v467_v41 }
 0x125   :  { %v135_v42 = vpop.permute.xlu0 %134  ;;  %485 = vmatpush.msra.mxu1 %v466_v44  ;;  %505 = vmatpush.msra.mxu2 %v466_v44 }
 0x126   :  { %v272_v60 = vpop.permute.xlu1 %271  ;;  %v140_v62 = vadd.f32 %v135_v42, %v120_v43  ;;  %v197_v15 = vpop.permute.xlu2 %196 }
 0x127   :  { %v276_v6 = vadd.f32 %v272_v60, %v256_v4  ;;  %486 = vmatpush.msra.mxu1 %v465_v45  ;;  %506 = vmatpush.msra.mxu2 %v465_v45 }
 0x128   :  { %v158_v63 = vadd.f32 %v153_v58, %v140_v62 }
 0x129   :  { %487 = vmatpush.msra.mxu1 %v464_v46  ;;  %507 = vmatpush.msra.mxu2 %v464_v46 }
 0x12a   :  { %v386_v2 = vld [vmem:[#allocation3 + $0x8] sm:$0xff]  ;;  %v166_v3 = vadd.f32 %v164_v0, %v158_v63 }
 0x12b   :  { %568 = vmatmul.msk.f32.vlgmr.msra.gmra.mxu3 %vm248_vm2, %v386_v2  ;;  %488 = vmatpush.msra.mxu1 %v463_v47 }
 0x12c   :  { %508 = vmatpush.msra.mxu2 %v463_v47 }
 0x12d   :  { %v358_v7 = vpop.permute.xlu0 %357  ;;  %489 = vmatpush.msra.mxu1 %v462_v27 }
 0x12e   :  { %v290_v8 = vpop.permute.xlu1 %289  ;;  %v363_v9 = vadd.f32 %v358_v7, %v345_v57  ;;  %v378_v25 = vpop.permute.xlu2 %377  ;;  %509 = vmatpush.msra.mxu2 %v462_v27 }
 0x12f   :  { %v294_v10 = vadd.f32 %v290_v8, %v276_v6  ;;  %490 = vmatpush.msra.mxu1 %v461_v49 }
 0x130   :  { %v381_v11 = vadd.f32 %v376_v55, %v363_v9  ;;  %510 = vmatpush.msra.mxu2 %v461_v49 }
 0x131   :  { %v302_v12 = vadd.f32 %v300_v48, %v294_v10  ;;  %491 = vmatpush.msra.mxu1 %v460_v51 }
 0x132   :  { %383 = vst.msk [vmem:[#allocation3 + $0x10] sm:$0xff] %vm248_vm2, %v381_v11  ;;  %511 = vmatpush.msra.mxu2 %v460_v51 }
 0x135   :  { %v179_v13 = vpop.permute.xlu0 %178 }
 0x136   :  { %v316_v59 = vpop.permute.xlu1 %315  ;;  %v184_v14 = vadd.f32 %v179_v13, %v166_v3 }
 0x137   :  { %v320_v19 = vadd.f32 %v316_v59, %v302_v12 }
 0x138   :  { %v202_v16 = vadd.f32 %v197_v15, %v184_v14 }
 0x139   :  { %v387_v17 = vld [vmem:[#allocation3 + $0x10] sm:$0xff] }
 0x13a   :  { %569 = vmatmul.msk.f32.gmra.mxu3 %vm248_vm2, %v387_v17  ;;  %v210_v18 = vadd.f32 %v208_v50, %v202_v16 }
 0x13d   :  { %v360_v21 = vpop.permute.xlu0 %359 }
 0x13e   :  { %v334_v20 = vpop.permute.xlu1 %333 }
 0x13f   :  { %v338_v22 = vadd.f32 %v334_v20, %v320_v19 }
 0x141   :  { %v346_v23 = vadd.f32 %v344_v61, %v338_v22 }
 0x143   :  { %v364_v24 = vadd.f32 %v360_v21, %v346_v23 }
 0x145   :  { %v382_v26 = vadd.f32 %v378_v25, %v364_v24  ;;  %v241_v31 = vpop.permute.xlu0 %240 }
 0x146   :  { %v223_v28 = vpop.permute.xlu1 %222 }
 0x147   :  { %384 = vst.msk [vmem:[#allocation3 + $0x18] sm:$0xff] %vm248_vm2, %v382_v26  ;;  %v228_v30 = vadd.f32 %v223_v28, %v210_v18 }
 0x149   :  { %v246_v5 = vadd.f32 %v241_v31, %v228_v30 }
 0x14b   :  { %249 = vst.msk [vmem:[#allocation3] sm:$0xff] %vm248_vm2, %v246_v5 }
 0x14e   :  { %v388_v32 = vld [vmem:[#allocation3 + $0x18] sm:$0xff] }
 0x14f   :  { %570 = vmatmul.msk.f32.gmra.mxu3 %vm248_vm2, %v388_v32 }
 0x152   :  { %v385_v33 = vld [vmem:[#allocation3] sm:$0xff] }
 0x153   :  { %567 = vmatmul.msk.f32.vlgmr.msra.gmra.mxu0 %vm248_vm2, %v385_v33 }
 0x1ae   :  { %v429_v35 = vpop.f32.mrf.mxu3 }
 0x1af   :  { %v448_v54 = vmul.f32 %v429_v35, %v429_v35 }
 0x1bd   :  { %v432_v52 = vpop.f32.mrf.mxu3 }
 0x1be   :  { %v449_v43 = vmul.f32 %v432_v52, %v432_v52 }
 0x1d0   :  { %v426_v53 = vpop.f32.mrf.mxu0 }
 0x1d1   :  { %v438_v56 = vadd.f32 %v429_v35, %v426_v53  ;;  %v447_v57 = vmul.f32 %v426_v53, %v426_v53 }
 0x1d2   :  { %v435_v58 = vpop.f32.mrf.mxu3 }
 0x1d3   :  { %v451_v42 = vadd.f32 %v448_v54, %v447_v57  ;;  %v439_v60 = vadd.f32 %v438_v56, %v432_v52  ;;  %v450_v63 = vmul.f32 %v435_v58, %v435_v58 }
 0x1d5   :  { %v440_v62 = vadd.f32 %v439_v60, %v435_v58  ;;  %v452_v0 = vadd.f32 %v451_v42, %v449_v43 }
 0x1d7   :  { %v441_v2 = vrot.slane %v440_v62, 4  ;;  %v453_v3 = vadd.f32 %v452_v0, %v450_v63 }
 0x1d9   :  { %v442_v4 = vadd.f32 %v441_v2, %v440_v62  ;;  %v454_v55 = vrot.slane %v453_v3, 4 }
 0x1db   :  { %v443_v6 = vrot.slane %v442_v4, 2  ;;  %v455_v7 = vadd.f32 %v454_v55, %v453_v3 }
 0x1dd   :  { %v444_v8 = vadd.f32 %v443_v6, %v442_v4  ;;  %v456_v9 = vrot.slane %v455_v7, 2 }
 0x1df   :  { %v445_v10 = vrot.slane %v444_v8, 1  ;;  %v457_v48 = vadd.f32 %v456_v9, %v455_v7 }
 0x1e1   :  { %v446_v11 = vadd.f32 %v445_v10, %v444_v8  ;;  %v458_v12 = vrot.slane %v457_v48, 1 }
 0x1e3   :  { %492 = vmatmul.f32.vlgmr.msra.gmra.mxu1 %v446_v11  ;;  %v459_v13 = vadd.f32 %v458_v12, %v457_v48 }
 0x1e5   :  { %512 = vmatmul.f32.vlgmr.msra.gmra.mxu2 %v459_v13 }
 0x260   :  { %v493_v59 = vpop.f32.mrf.mxu1 }
 0x261   :  { %v516_v14 = vmul.f32 0.001953125, %v493_v59 }
 0x263   :  { %v518_v16 = vmul.f32 %v516_v14, %v516_v14  ;;  %v532_v24 = vperm.slane %v516_v14, 0 }
 0x265   :  { %v533_v28 = vsub.f32 %v426_v53, %v532_v24  ;;  %v534_v30 = vsub.f32 %v429_v35, %v532_v24  ;;  %v535_v31 = vsub.f32 %v432_v52, %v532_v24  ;;  %v536_v32 = vsub.f32 %v435_v58, %v532_v24 }
 0x268   :  { %v513_v15 = vpop.f32.mrf.mxu2 }
 0x269   :  { %v517_v50 = vmul.f32 0.001953125, %v513_v15 }
 0x26b   :  { %v519_v17 = vsub.f32 %v517_v50, %v518_v16 }
 0x26d   :  { %v520_v18 = vmax.f32 %v519_v17, 0.0 }
 0x26f   :  { %v521_v19 = vadd.f32 1e-05, %v520_v18 }
 0x271   :  { %608 = vrsqrt.f32 %v521_v19  ;;  %vm528_vm4 = vweird.f32 %v521_v19 }
 0x277   :  { %v609_v20 = vpop.eup %608 }
 0x278   :  { %v523_v21 = vmul.f32 %v609_v20, %v521_v19  ;;  %vm529_vm3 = vweird.f32 %v609_v20 }
 0x279   :  { %vm530_vm5 = vmor %vm528_vm4, %vm529_vm3 }
 0x27a   :  { %v524_v22 = vmul.f32 %v609_v20, %v523_v21 }
 0x27c   :  { %v525_v61 = vmul.f32 0.5, %v524_v22 }
 0x27e   :  { %v526_v23 = vsub.f32 1.5, %v525_v61 }
 0x280   :  { %v527_v25 = vmul.f32 %v609_v20, %v526_v23 }
 0x282   :  { %v531_v26 = vsel %vm530_vm5, %v609_v20, %v527_v25 }
 0x283   :  { %v537_v5 = vperm.slane %v531_v26, 0 }
 0x285   :  { %v538_v33 = vmul.f32 %v537_v5, %v533_v28  ;;  %v539_v34 = vmul.f32 %v537_v5, %v534_v30  ;;  %v540_v1 = vmul.f32 %v537_v5, %v535_v31  ;;  %v541_v36 = vmul.f32 %v537_v5, %v536_v32 }
 0x287   :  { %542 = vst [vmem:[#allocation12] sm:$0xff] %v538_v33 }
 0x288   :  { %543 = vst [vmem:[#allocation12 + $0x8] sm:$0xff] %v539_v34 }
 0x289   :  { %544 = vst [vmem:[#allocation12 + $0x10] sm:$0xff] %v540_v1 }
 0x28a   :  { %545 = vst [vmem:[#allocation12 + $0x18] sm:$0xff] %v541_v36 }
 0x28b   :  { %558 = dma.vmem_to_hbm [thread:$0]  %s551_s11, 512, %s553_s14, [#allocation6], %s739_s23, %s739_s23, %s740_s24  }
 0x28c   :  { %736 = dma.done.wait [#allocation6], 512  }
 0x28d   :  { %737 = vsyncadd [#allocation6], 4294966784 }
 0x28e   :  { %563 = vsyncpa [#allocation5], 1 }
 0x28f   :  { %564 = vsyncpa [#allocation8], 1 }
 0x290   :  { %565 = vsyncpa [#allocation11], 1 }
 0x291   :  { %566 = vsyncpa [#allocation6], 1 }

</bundles_post_ra>
